<compile_context>
chip_gen: v6e
topology: v6e:2x2x1
jax: 0.10.0
libtpu: 0.0.40
codegen_flags: <defaults>
</compile_context>

<pallas_src>
import jax
import jax.numpy as jnp
from jax import lax
from jax.experimental import pallas as pl
from jax.experimental.pallas import tpu as pltpu

ALPHA = 0.25
GAMMA = 2.0          # focal gamma (== 2 -> implemented as p*p)
EPS = 1e-8


def _choose_tile(full, target, quantum):
    """Largest multiple of `quantum` that divides `full` and is <= target, else `full`."""
    if full <= target:
        return full
    t = (target // quantum) * quantum
    while t >= quantum:
        if full % t == 0:
            return t
        t -= quantum
    return full


# --------------------------- dice coefficient --------------------------------

def _dice_kernel(pm_ref, tm_ref, o_ref, mm_acc, ts_acc):
    # pm_ref: [bq_tile, hw_tile] (pred-mask logits, any float dtype)
    # tm_ref: [NI+1, hw_tile]    (target masks with a ones row appended)
    # o_ref:  [NI, bq_tile]      (output; also the across-frame accumulator)
    # mm_acc: [NI+1, bq_tile];  ts_acc: [NI+1, 1]   (per-frame partials over HW)
    t = pl.program_id(1)
    hw = pl.program_id(2)
    nt = pl.num_programs(1)
    nhw = pl.num_programs(2)

    @pl.when((t == 0) & (hw == 0))
    def _():
        o_ref[...] = jnp.zeros_like(o_ref)

    @pl.when(hw == 0)
    def _():
        mm_acc[...] = jnp.zeros_like(mm_acc)
        ts_acc[...] = jnp.zeros_like(ts_acc)

    x = pm_ref[...].astype(jnp.float32)
    sig = 0.5 * (jnp.tanh(0.5 * x) + 1.0)          # sigmoid via a single tanh (EUP)
    tgt = tm_ref[...]                               # [NI+1, hw_tile], f32

    # rows 0..NI-1: sum_hw(sig * tgt);  row NI (ones row): sum_hw(sig)
    mm_acc[...] += lax.dot_general(tgt, sig, (((1,), (1,)), ((), ())),
                                   preferred_element_type=jnp.float32)
    ts_acc[...] += jnp.sum(tgt, axis=-1, keepdims=True)     # [NI+1, 1]

    @pl.when(hw == nhw - 1)
    def _():
        ni = o_ref.shape[0]
        mm = mm_acc[...]
        ts = ts_acc[...]
        num = 2.0 * mm[:ni, :] + 1.0                          # [NI, bq]
        den = mm[ni:ni + 1, :] + ts[:ni, :] + 1.0             # [1,bq] + [NI,1]
        o_ref[...] += num / den

    @pl.when((t == nt - 1) & (hw == nhw - 1))
    def _():
        o_ref[...] = o_ref[...] * (1.0 / nt)


def dice_coef(pred_masks_flat, tgt_masks_flat, *, bq_tile_target=512, hw_tile_target=2048):
    """pred_masks_flat: [T, BQ, HW] (any float dtype, bf16 ok);
       tgt_masks_flat:  [T, NI, HW] (natural layout).  Returns [BQ, NI] f32."""
    T, BQ, HW = pred_masks_flat.shape
    NI = tgt_masks_flat.shape[1]
    NIA = NI + 1
    bq_tile = _choose_tile(BQ, bq_tile_target, 128)   # lane-dense output quantum
    hw_tile = _choose_tile(HW, hw_tile_target, 128)

    # ones row folds sum(sigmoid(p)) into the same matmul
    tgt_aug = jnp.concatenate(
        [tgt_masks_flat.astype(jnp.float32), jnp.ones((T, 1, HW), jnp.float32)], axis=1)

    out = pl.pallas_call(
        _dice_kernel,
        out_shape=jax.ShapeDtypeStruct((NI, BQ), jnp.float32),
        grid=(BQ // bq_tile, T, HW // hw_tile),
        in_specs=[pl.BlockSpec((None, bq_tile, hw_tile), lambda b, t, h: (t, b, h)),
                  pl.BlockSpec((None, NIA, hw_tile), lambda b, t, h: (t, 0, h))],
        out_specs=pl.BlockSpec((NI, bq_tile), lambda b, t, h: (0, b)),
        scratch_shapes=[pltpu.VMEM((NIA, bq_tile), jnp.float32),
                        pltpu.VMEM((NIA, 1), jnp.float32)],
        compiler_params=pltpu.CompilerParams(
            dimension_semantics=("parallel", "arbitrary", "arbitrary"),
            vmem_limit_bytes=32 * 1024 * 1024),
    )(pred_masks_flat, tgt_aug)
    return out.T                                     # [BQ, NI]


# ------------------ fused per-frame costs: focal cls + L1 box + GIoU --------

def _frame_cost_kernel(cls_ref, vis_ref, pb_ref, tb_ref,
                       cls_out, l1_out, gi_out, vis_acc):
    # cls_ref: [1, BQ] class-0 logits of frame t; vis_ref: [NIc, 1] visibility
    # pb_ref:  [4, BQ] pred boxes (coords as lane-dense rows, cxcywh)
    # tb_ref:  [NI, 4] target boxes (coords as sublane columns, cxcywh)
    # cls_out/l1_out/gi_out are the (resident) output blocks; they serve as the
    # across-frame accumulators directly.
    t = pl.program_id(0)
    nt = pl.num_programs(0)

    @pl.when(t == 0)
    def _():
        cls_out[...] = jnp.zeros_like(cls_out)
        l1_out[...] = jnp.zeros_like(l1_out)
        gi_out[...] = jnp.zeros_like(gi_out)
        vis_acc[...] = jnp.zeros_like(vis_acc)

    # focal-style classification cost on the class-0 column
    x = cls_ref[...]
    p = jax.nn.sigmoid(x)
    one_m_p = 1.0 - p
    neg = (1.0 - ALPHA) * (p * p) * (-jnp.log(one_m_p + EPS))        # gamma == 2
    pos = ALPHA * (one_m_p * one_m_p) * (-jnp.log(p + EPS))
    col = pos - neg                                                   # [1, BQ]
    v = vis_ref[...]                                                  # [NIc, 1]
    cls_out[...] += v * col                                           # [NIc, BQ]
    vis_acc[...] += v

    # pairwise box costs, lane-dense over queries: [NI,1] op [1,BQ] -> [NI,BQ]
    pb = pb_ref[...]
    tb = tb_ref[...]
    ocx, ocy, ow, oh = pb[0:1, :], pb[1:2, :], pb[2:3, :], pb[3:4, :]   # [1, BQ]
    tcx, tcy, tw, th = tb[:, 0:1], tb[:, 1:2], tb[:, 2:3], tb[:, 3:4]   # [NI, 1]

    # L1 cdist in cxcywh space (torch.cdist p=1)
    l1_out[...] += (jnp.abs(tcx - ocx) + jnp.abs(tcy - ocy)
                    + jnp.abs(tw - ow) + jnp.abs(th - oh))

    # generalized IoU in xyxy space
    ox0, ox1 = ocx - 0.5 * ow, ocx + 0.5 * ow
    oy0, oy1 = ocy - 0.5 * oh, ocy + 0.5 * oh
    tx0, tx1 = tcx - 0.5 * tw, tcx + 0.5 * tw
    ty0, ty1 = tcy - 0.5 * th, tcy + 0.5 * th
    area_o = (ox1 - ox0) * (oy1 - oy0)
    area_t = (tx1 - tx0) * (ty1 - ty0)
    iw = jnp.maximum(jnp.minimum(ox1, tx1) - jnp.maximum(ox0, tx0), 0.0)
    ih = jnp.maximum(jnp.minimum(oy1, ty1) - jnp.maximum(oy0, ty0), 0.0)
    inter = iw * ih
    union = area_o + area_t - inter
    iou = inter / (union + EPS)
    ew = jnp.maximum(ox1, tx1) - jnp.minimum(ox0, tx0)
    eh = jnp.maximum(oy1, ty1) - jnp.minimum(oy0, ty0)
    earea = ew * eh
    giou = iou - (earea - union) / (earea + EPS)
    gi_out[...] += -giou

    @pl.when(t == nt - 1)
    def _():
        inv_t = 1.0 / nt
        cls_out[...] = cls_out[...] / jnp.maximum(vis_acc[...], 1.0)   # mean over visible frames
        l1_out[...] = l1_out[...] * inv_t
        gi_out[...] = gi_out[...] * inv_t


def frame_costs(pred_cls, vis, pred_boxes, tgt_boxes):
    """pred_cls: [T,B,Q,K]; vis: [T,NIc,1]; pred_boxes: [T,B,Q,4]; tgt_boxes: [T,NI,4].
       Returns (cost_cls [BQ,NIc], cost_box [BQ,NI], cost_giou [BQ,NI]) in f32."""
    T, B, Q, K = pred_cls.shape
    BQ = B * Q
    NIc = vis.shape[1]
    NI = tgt_boxes.shape[1]
    cls0 = pred_cls.reshape(T, BQ, K)[:, :, 0].reshape(T, 1, BQ)       # class-0 logit row
    pb = pred_boxes.reshape(T, BQ, 4).transpose(0, 2, 1)               # [T, 4, BQ]

    cls_c, l1_c, gi_c = pl.pallas_call(
        _frame_cost_kernel,
        out_shape=(jax.ShapeDtypeStruct((NIc, BQ), jnp.float32),
                   jax.ShapeDtypeStruct((NI, BQ), jnp.float32),
                   jax.ShapeDtypeStruct((NI, BQ), jnp.float32)),
        grid=(T,),
        in_specs=[pl.BlockSpec((None, 1, BQ), lambda t: (t, 0, 0)),
                  pl.BlockSpec((None, NIc, 1), lambda t: (t, 0, 0)),
                  pl.BlockSpec((None, 4, BQ), lambda t: (t, 0, 0)),
                  pl.BlockSpec((None, NI, 4), lambda t: (t, 0, 0))],
        out_specs=(pl.BlockSpec((NIc, BQ), lambda t: (0, 0)),
                   pl.BlockSpec((NI, BQ), lambda t: (0, 0)),
                   pl.BlockSpec((NI, BQ), lambda t: (0, 0))),
        scratch_shapes=[pltpu.VMEM((NIc, 1), jnp.float32)],
        compiler_params=pltpu.CompilerParams(dimension_semantics=("arbitrary",)),
    )(cls0.astype(jnp.float32), vis.astype(jnp.float32),
      pb.astype(jnp.float32), tgt_boxes.astype(jnp.float32))
    return cls_c.T, l1_c.T, gi_c.T


# --------------------------- text-refer cost ----------------------------------

def _text_refer_kernel(logit_ref, txt_ref, o_ref):
    # logit_ref: [B, Q, D], txt_ref: [B, 1, D], o_ref: [B, Q]
    l = logit_ref[...]
    tt = txt_ref[...]
    sim = jnp.sum(l * tt, axis=-1)                       # [B, Q] (lane reduce over D)
    m = jnp.max(sim, axis=-1, keepdims=True)
    e = jnp.exp(sim - m)
    s = jnp.sum(e, axis=-1, keepdims=True)
    o_ref[...] = -(e / s)                                # -softmax over queries


def text_refer_cost(pred_logit, text_feature):
    B, Q, D = pred_logit.shape
    txt = text_feature.reshape(B, 1, D)
    out = pl.pallas_call(
        _text_refer_kernel,
        out_shape=jax.ShapeDtypeStruct((B, Q), jnp.float32),
        grid=(1,),
        in_specs=[pl.BlockSpec((B, Q, D), lambda i: (0, 0, 0)),
                  pl.BlockSpec((B, 1, D), lambda i: (0, 0, 0))],
        out_specs=pl.BlockSpec((B, Q), lambda i: (0, 0)),
    )(pred_logit.astype(jnp.float32), txt.astype(jnp.float32))
    return out.reshape(B * Q, 1)


# ------------------------------- Matcher ------------------------------------

class HungarianMatcherPallas:
    """Pallas port of HungarianMatcher.forward (num_classes == 1 paths)."""

    def __init__(self, cost_con=1, cost_dice=1, cost_cls=1, cost_box=1,
                 cost_giou=1, num_classes=1):
        self.num_classes = num_classes
        self.cost_con = cost_con
        self.cost_dice = cost_dice
        self.cost_cls = cost_cls
        self.cost_box = cost_box
        self.cost_giou = cost_giou

    def __call__(self, outputs, tgt_masks, tgt_boxes, is_ref_inst_visible,
                 num_traj_per_batch):
        t, bs, nq = outputs['pred_masks'].shape[:3]
        H, W = tgt_masks.shape[-2:]
        BQ = bs * nq

        # TODO(synk): bilinear F.interpolate of pred masks to the target mask resolution is
        # omitted; this example uses equal resolutions where interpolate is the identity.
        assert outputs['pred_masks'].shape[-2:] == (H, W)
        out_masks_flat = outputs['pred_masks'].reshape(t, BQ, H * W)    # keep input dtype
        tgt_masks_flat = tgt_masks.reshape(t, -1, H * W)                # [T, NI, HW] natural layout

        cost_con = (text_refer_cost(outputs['pred_logit'],
                                    outputs['text_sentence_feature'])
                    if self.cost_con > 0 else 0.0)

        cost_cls, cost_box, cost_giou = 0.0, 0.0, 0.0
        if self.cost_cls > 0 or self.cost_box > 0 or self.cost_giou > 0:
            vis = (jnp.ones((1, 1, 1), jnp.float32) if t == 1
                   else is_ref_inst_visible.astype(jnp.float32).T[:, :, None])   # [T, NI, 1]
            cls_c, box_c, giou_c = frame_costs(outputs['pred_cls'], vis,
                                               outputs['pred_boxes'], tgt_boxes)
            if self.cost_cls > 0:
                cost_cls = cls_c
            if self.cost_box > 0:
                cost_box = box_c
            if self.cost_giou > 0:
                cost_giou = giou_c

        cost_dice = (-dice_coef(out_masks_flat, tgt_masks_flat)
                     if self.cost_dice > 0 else 0.0)

        # Faithful to the reference: only the classification cost enters C.
        C = self.cost_cls * cost_cls
        C = C.reshape(bs, nq, -1)

        # TODO(synk): general Hungarian assignment (scipy.linear_sum_assignment) has no Pallas
        # equivalent; with one target per sample the optimum is the argmin query.
        nis = [int(n) for n in num_traj_per_batch]
        assert all(n == 1 for n in nis)
        offs, o = [], 0
        for n in nis:
            offs.append(o)
            o += n
        col = jnp.minimum(jnp.asarray(offs, jnp.int32), C.shape[-1] - 1)
        sel = C[jnp.arange(bs), :, col]                   # [bs, nq]
        rows = jnp.argmin(sel, axis=1).astype(jnp.int32)  # per-batch argmin query
        zeros1 = jnp.zeros((1,), jnp.int32)
        indices = [(rows[i:i + 1], zeros1) for i in range(bs)]

        aux = dict(cost_con=cost_con, cost_cls=cost_cls, cost_box=cost_box,
                   cost_giou=cost_giou, cost_dice=cost_dice)
        return indices, aux


# --------------------------------- Demo --------------------------------------

if __name__ == "__main__":
    key = jax.random.PRNGKey(0)
    t, bs, nq, k = 2, 2, 8, 2         # time, batch, queries, class logits
    H = W = 16
    d = 32
    ninst = bs                        # one referred instance per batch sample

    keys = jax.random.split(key, 9)
    pred_cls = jax.random.normal(keys[0], (t, bs, nq, k), jnp.float32)
    pred_masks = jax.random.normal(keys[1], (t, bs, nq, H, W), jnp.float32)
    pred_logit = jax.random.normal(keys[2], (bs, nq, d), jnp.float32)
    text_feat = jax.random.normal(keys[3], (bs, d), jnp.float32)
    cxy_p = jax.random.uniform(keys[4], (t, bs, nq, 2), minval=0.3, maxval=0.7)
    wh_p = jax.random.uniform(keys[5], (t, bs, nq, 2), minval=0.1, maxval=0.4)
    pred_boxes = jnp.concatenate([cxy_p, wh_p], axis=-1)
    tgt_masks = (jax.random.uniform(keys[6], (t, ninst, H, W)) > 0.5).astype(jnp.float32)
    cxy_t = jax.random.uniform(keys[7], (t, ninst, 2), minval=0.3, maxval=0.7)
    wh_t = jax.random.uniform(keys[8], (t, ninst, 2), minval=0.1, maxval=0.4)
    tgt_boxes = jnp.concatenate([cxy_t, wh_t], axis=-1)
    is_ref_inst_visible = jnp.ones((ninst, t), jnp.float32)
    num_traj_per_batch = [1] * bs

    outputs = dict(pred_cls=pred_cls, pred_masks=pred_masks, pred_boxes=pred_boxes,
                   pred_logit=pred_logit, text_sentence_feature=text_feat)

    matcher = HungarianMatcherPallas()
    indices, aux = matcher(outputs, tgt_masks, tgt_boxes, is_ref_inst_visible,
                           num_traj_per_batch)
    jax.block_until_ready([indices, aux])

    # ---------------- pure-JAX references ----------------
    BQ = bs * nq

    # classification (focal) cost, mean over visible frames (all visible here)
    p = jax.nn.sigmoid(pred_cls.reshape(t, BQ, k))
    neg = (1 - ALPHA) * p ** GAMMA * -jnp.log(1 - p + EPS)
    pos = ALPHA * (1 - p) ** GAMMA * -jnp.log(p + EPS)
    colr = (pos - neg)[:, :, 0]                              # [T, BQ]
    ref_cls = jnp.stack([colr.mean(0)] * ninst, axis=-1)     # [BQ, NI]
    assert jnp.allclose(aux['cost_cls'], ref_cls, atol=1e-3, rtol=1e-3)

    # L1 box cost (cdist p=1 on cxcywh), mean over T
    ob = pred_boxes.reshape(t, BQ, 4)
    ref_box = jnp.abs(ob[:, :, None, :] - tgt_boxes[:, None, :, :]).sum(-1).mean(0)
    assert jnp.allclose(aux['cost_box'], ref_box, atol=1e-3, rtol=1e-3)

    # -GIoU cost, mean over T
    def _to_xyxy(b):
        cx, cy, w, h = b[..., 0], b[..., 1], b[..., 2], b[..., 3]
        return jnp.stack([cx - 0.5 * w, cy - 0.5 * h, cx + 0.5 * w, cy + 0.5 * h], -1)
    a = _to_xyxy(ob)[:, :, None, :]
    b = _to_xyxy(tgt_boxes)[:, None, :, :]
    area_a = (a[..., 2] - a[..., 0]) * (a[..., 3] - a[..., 1])
    area_b = (b[..., 2] - b[..., 0]) * (b[..., 3] - b[..., 1])
    wh_i = jnp.clip(jnp.minimum(a[..., 2:], b[..., 2:]) - jnp.maximum(a[..., :2], b[..., :2]), 0)
    inter = wh_i[..., 0] * wh_i[..., 1]
    union = area_a + area_b - inter
    wh_e = jnp.maximum(a[..., 2:], b[..., 2:]) - jnp.minimum(a[..., :2], b[..., :2])
    earea = wh_e[..., 0] * wh_e[..., 1]
    ref_giou = -(inter / union - (earea - union) / earea)
    ref_giou = ref_giou.mean(0)
    assert jnp.allclose(aux['cost_giou'], ref_giou, atol=1e-3, rtol=1e-3)

    # dice cost, mean over T
    sp = jax.nn.sigmoid(pred_masks.reshape(t, BQ, H * W))
    tm = tgt_masks.reshape(t, ninst, H * W)
    numr = 2.0 * jnp.einsum('tqh,tnh->tqn', sp, tm)
    denr = sp.sum(-1)[:, :, None] + tm.sum(-1)[:, None, :]
    ref_dice = -((numr + 1.0) / (denr + 1.0)).mean(0)
    assert jnp.allclose(aux['cost_dice'], ref_dice, atol=2e-3, rtol=2e-3)

    # text-refer cost: -softmax over queries of logit . text
    sim = jnp.einsum('bqd,bd->bq', pred_logit, text_feat)
    ref_con = -jax.nn.softmax(sim, axis=-1).reshape(BQ, 1)
    assert jnp.allclose(aux['cost_con'], ref_con, atol=1e-3, rtol=1e-3)

    # assignment indices (ni == 1 -> argmin query on the class cost)
    ref_rows = jnp.argmin(ref_cls.reshape(bs, nq, ninst)[jnp.arange(bs), :, jnp.arange(bs)], axis=1)
    for i, (ri, ci) in enumerate(indices):
        assert ri.shape == (1,) and ci.shape == (1,)
        assert int(ri[0]) == int(ref_rows[i])

    print("KERNEL_OK")
</pallas_src>

<mosaic_0001>
module attributes {stable_mosaic.version = 11 : i64} {
  func.func @_text_refer_kernel(%arg0: i32, %arg1: memref<2x8x32xf32, #tpu.memory_space<vmem>>, %arg2: memref<2x1x32xf32, #tpu.memory_space<vmem>>, %arg3: memref<2x8xf32, #tpu.memory_space<vmem>>) attributes {dimension_semantics = [#tpu.dimension_semantics<arbitrary>], iteration_bounds = array<i64: 1>, scalar_prefetch = 0 : i64, scratch_operands = 0 : i64, tpu.core_type = #tpu.core_type<tc>, window_params = [{pipeline_mode = #tpu.pipeline_mode<synchronous>, transform_indices = @transform_0, window_bounds = array<i64: 2, 8, 32>}, {pipeline_mode = #tpu.pipeline_mode<synchronous>, transform_indices = @transform_1, window_bounds = array<i64: 2, 1, 32>}, {pipeline_mode = #tpu.pipeline_mode<synchronous>, transform_indices = @transform_2, window_bounds = array<i64: 2, 8>}]} {
    %c0 = arith.constant 0 : index
    %c0_0 = arith.constant 0 : index
    %c0_1 = arith.constant 0 : index
    %0 = vector.load %arg1[%c0, %c0_0, %c0_1] : memref<2x8x32xf32, #tpu.memory_space<vmem>>, vector<2x8x32xf32>
    %c0_2 = arith.constant 0 : index
    %c0_3 = arith.constant 0 : index
    %c0_4 = arith.constant 0 : index
    %1 = vector.load %arg2[%c0_2, %c0_3, %c0_4] : memref<2x1x32xf32, #tpu.memory_space<vmem>>, vector<2x1x32xf32>
    %2 = vector.broadcast %1 : vector<2x1x32xf32> to vector<2x8x32xf32>
    %3 = arith.mulf %0, %2 : vector<2x8x32xf32>
    %cst = arith.constant dense<0.000000e+00> : vector<2x8xf32>
    %4 = vector.multi_reduction <add>, %3, %cst [2] : vector<2x8x32xf32> to vector<2x8xf32>
    %cst_5 = arith.constant dense<0xFF800000> : vector<2xf32>
    %5 = vector.multi_reduction <maximumf>, %4, %cst_5 [1] : vector<2x8xf32> to vector<2xf32>
    %6 = vector.shape_cast %5 : vector<2xf32> to vector<2x1xf32>
    %7 = vector.broadcast %6 : vector<2x1xf32> to vector<2x8xf32>
    %8 = arith.subf %4, %7 : vector<2x8xf32>
    %9 = math.exp %8 : vector<2x8xf32>
    %cst_6 = arith.constant dense<0.000000e+00> : vector<2xf32>
    %10 = vector.multi_reduction <add>, %9, %cst_6 [1] : vector<2x8xf32> to vector<2xf32>
    %11 = vector.shape_cast %10 : vector<2xf32> to vector<2x1xf32>
    %12 = vector.broadcast %11 : vector<2x1xf32> to vector<2x8xf32>
    %13 = arith.divf %9, %12 : vector<2x8xf32>
    %cst_7 = arith.constant 0.000000e+00 : f32
    %14 = vector.broadcast %cst_7 : f32 to vector<2x8xf32>
    %15 = arith.subf %14, %13 : vector<2x8xf32>
    %c0_8 = arith.constant 0 : index
    %c0_9 = arith.constant 0 : index
    %16 = vector.load %arg3[%c0_8, %c0_9] : memref<2x8xf32, #tpu.memory_space<vmem>>, vector<2x8xf32>
    tpu.vector_store %arg3[%c0_8, %c0_9], %15 {strides = array<i32>} : memref<2x8xf32, #tpu.memory_space<vmem>>, vector<2x8xf32>,
    return
  }
  func.func @transform_0(%arg0: i32) -> (i32, i32, i32) {
    %c0_i32 = arith.constant 0 : i32
    %c0_i32_0 = arith.constant 0 : i32
    %c0_i32_1 = arith.constant 0 : i32
    %c0_i32_2 = arith.constant 0 : i32
    return %c0_i32, %c0_i32_0, %c0_i32_1 : i32, i32, i32
  }
  func.func @transform_1(%arg0: i32) -> (i32, i32, i32) {
    %c0_i32 = arith.constant 0 : i32
    %c0_i32_0 = arith.constant 0 : i32
    %c0_i32_1 = arith.constant 0 : i32
    %c0_i32_2 = arith.constant 0 : i32
    return %c0_i32, %c0_i32_0, %c0_i32_1 : i32, i32, i32
  }
  func.func @transform_2(%arg0: i32) -> (i32, i32) {
    %c0_i32 = arith.constant 0 : i32
    %c0_i32_0 = arith.constant 0 : i32
    %c0_i32_1 = arith.constant 0 : i32
    return %c0_i32, %c0_i32_0 : i32, i32
  }
}

</mosaic_0001>

<bundles_post_ra>
// kernel: tpu_custom_call.1
= control target key start
LH: loop header
LB: loop body
LE: loop exit
PB: predicated region body
PF: predicated region fallthrough
CT: control target
= control target key end

     0   :  { %7 = vsyncpa [#allocation3], 0  ;;  %s298_s0 = inlined_call_operand.hbm [shape: f32[2,8,32], index: 0, kind: input, shape index: {}]   ;;  %s299_s1 = inlined_call_operand.hbm [shape: f32[2,1,32], index: 1, kind: input, shape index: {}]   ;;  %s300_s2 = inlined_call_operand.hbm [shape: f32[2,8], index: 2, kind: output, shape index: {}]  }
   0x1   :  { %8 = vsyncpa [#allocation6], 0 }
   0x2   :  { %9 = vsyncpa [#allocation4], 0  ;;  %s260_s9 = smov [#allocation2]  }
   0x3   :  { %s15_s10 = sshll.u32 %s260_s9, 4  ;;  %s16_s10 = int_to_ptr.vmem [resolvable:$true] %s15_s10 }
   0x4   :  { %s202_s11 = scalar_lea.vmem %s16_s10, 256  ;;  %p207_p1 = scmp.lt.s32.totalorder %s16_s10, %s16_s10 }
   0x5   :  { %p203_p0 = scmp.ne.s32.totalorder %s16_s10, %s202_s11  ;;  %p208_p2 = scmp.lt.s32.totalorder %s202_s11, %s202_s11 }
   0x7   :  { %p209_p3 = por %p208_p2, %p207_p1 }
   0x9   :  { %p210_p4 = pnand %p209_p3, %p203_p0 }
   0xb   :  { %213 = shalt.err (!%p210_p4)
}
   0xc   :  { %s261_s12 = smov 128   ;;  %s262_s13 = smov 8  }
   0xd   :  { %21 = dma.hbm_to_vmem [thread:$0]  %s298_s0, 256, %s16_s10, [#allocation3], %s261_s12, %s261_s12, %s262_s13  }
   0xe   :  { %s263_s16 = smov [#allocation5]  }
   0xf   :  { %s27_s17 = sshll.u32 %s263_s16, 4  ;;  %s28_s17 = int_to_ptr.vmem [resolvable:$true] %s27_s17 }
  0x10   :  { %s222_s18 = scalar_lea.vmem %s28_s17, 32  ;;  %p227_p6 = scmp.lt.s32.totalorder %s28_s17, %s28_s17 }
  0x11   :  { %p223_p5 = scmp.ne.s32.totalorder %s28_s17, %s222_s18  ;;  %p228_p7 = scmp.lt.s32.totalorder %s222_s18, %s222_s18 }
  0x13   :  { %p229_p8 = por %p228_p7, %p227_p6 }
  0x15   :  { %p230_p9 = pnand %p229_p8, %p223_p5 }
  0x17   :  { %233 = shalt.err (!%p230_p9)
}
  0x18   :  { %s264_s19 = smov 16   ;;  %s265_s20 = smov 1  }
  0x19   :  { %33 = dma.hbm_to_vmem [thread:$0]  %s299_s1, 32, %s28_s17, [#allocation6], %s264_s19, %s264_s19, %s265_s20  }
  0x1a   :  { %254 = dma.done.wait [#allocation3], 256  }
  0x1b   :  { %255 = vsyncadd [#allocation3], 4294967040 }
  0x1c   :  { %256 = dma.done.wait [#allocation6], 32  }
  0x1d   :  { %257 = vsyncadd [#allocation6], 4294967264  ;;  %v40_v0 = vld [vmem:[#allocation2] sm:$0xff]  ;;  %v174_v1 = vld [vmem:[#allocation5] ss:$0 sm:$0xff]  ;;  %vm58_vm0 = vcmask 261120   ;;  %v67_v8 = vlaneseq }
  0x1e   :  { %v41_v2 = vld [vmem:[#allocation2 + $0x8] sm:$0xff]  ;;  %v56_v3 = vmul.f32 %v174_v1, %v40_v0  ;;  %v175_v4 = vld [vmem:[#allocation5 + $0x1] ss:$0 sm:$0xff]  ;;  %vm77_vm1 = vcmask 1041409   ;;  %vm80_vm2 = vcmask 58368   ;;  %v266_v18 = vmov 0  }
  0x1f   :  { %v57_v5 = vmul.f32 %v175_v4, %v41_v2  ;;  %v68_v9 = vand.u32 127, %v67_v8  ;;  %v70_v10 = vshrl.u32 %v67_v8, 7  ;;  %185 = vset.pattern.permute.xlu0 %v266_v18  ;;  %184 = vset.pattern.permute.xlu1 %v266_v18  ;;  %s267_s0 = smov [#allocation7]  }
  0x20   :  { %v59_v6 = vsel %vm58_vm0, %v56_v3, 0.0  ;;  %s164_s1 = sshll.u32 %s267_s0, 4  ;;  %s165_s1 = int_to_ptr.vmem [resolvable:$true] %s164_s1 }
  0x21   :  { %60 = vadd.xlane.f32.xlu0 %v59_v6  ;;  %v62_v7 = vsel %vm58_vm0, %v57_v5, 0.0  ;;  %v71_v12 = vsub.s32 %v68_v9, %v70_v10  ;;  %v87_v19 = vsub.s32 0, %v70_v10  ;;  %v91_v20 = vsub.s32 1, %v70_v10  ;;  %s234_s23 = scalar_lea.vmem %s165_s1, 32  ;;  %p239_p11 = scmp.lt.s32.totalorder %s165_s1, %s165_s1 }
  0x22   :  { %p235_p10 = scmp.ne.s32.totalorder %s165_s1, %s234_s23  ;;  %p240_p12 = scmp.lt.s32.totalorder %s234_s23, %s234_s23 }
  0x24   :  { %p241_p13 = por %p240_p12, %p239_p11 }
  0x25   :  { %63 = vadd.xlane.f32.xlu0 %v62_v7 }
  0x26   :  { %p242_p0 = pnand %p241_p13, %p235_p10 }
  0xaa   :  { %v61_v11 = vpop.xlane.xlu0 %60 }
  0xab   :  { %v72_v14 = vrot.slane %v61_v11, %v71_v12 }
  0xae   :  { %v64_v13 = vpop.xlane.xlu0 %63 }
  0xaf   :  { %v76_v15 = vrot.slane %v64_v13, %v71_v12 }
  0xb1   :  { %v78_v16 = vsel %vm77_vm1, %v76_v15, %v72_v14 }
  0xb2   :  { %v81_v17 = vsel %vm80_vm2, %v78_v16, -inf }
  0xb3   :  { %82 = vmax.xlane.f32.xlu1 %v81_v17 }
 0x13c   :  { %v83_v21 = vpop.xlane.xlu1 %82 }
 0x13d   :  { %v88_v22 = vrot.slane %v83_v21, %v87_v19  ;;  %v92_v23 = vrot.slane %v83_v21, %v91_v20 }
 0x13f   :  { %v95_v24 = vsub.f32 %v61_v11, %v88_v22  ;;  %v96_v25 = vsub.f32 %v64_v13, %v92_v23 }
 0x141   :  { %v97_v26 = vmul.f32 1.442695, %v95_v24  ;;  %v99_v27 = vmul.f32 1.442695, %v96_v25 }
 0x143   :  { %186 = vpow2.f32 %v97_v26 }
 0x144   :  { %188 = vpow2.f32 %v99_v27 }
 0x150   :  { %v187_v28 = vpop.eup %186 }
 0x151   :  { %v189_v29 = vpop.eup %188  ;;  %104 = vperm.xlu1 %184, %v187_v28  }
 0x152   :  { %107 = vperm.xlu0 %185, %v189_v29  }
 0x1cc   :  { %v105_v30 = vpop.permute.xlu1 %104 }
 0x1cd   :  { %v108_v31 = vpop.permute.xlu0 %107  ;;  %v112_v32 = vrot.slane %v105_v30, %v71_v12 }
 0x1ce   :  { %v116_v33 = vrot.slane %v108_v31, %v71_v12 }
 0x1d0   :  { %v117_v34 = vsel %vm77_vm1, %v116_v33, %v112_v32 }
 0x1d1   :  { %v119_v35 = vsel %vm80_vm2, %v117_v34, 0.0 }
 0x1d2   :  { %120 = vadd.xlane.f32.xlu1 %v119_v35 }
 0x25b   :  { %v121_v36 = vpop.xlane.xlu1 %120 }
 0x25c   :  { %v126_v37 = vrot.slane %v121_v36, %v87_v19  ;;  %v130_v38 = vrot.slane %v121_v36, %v91_v20 }
 0x25e   :  { %190 = vrcp.f32 %v126_v37 }
 0x25f   :  { %192 = vrcp.f32 %v130_v38 }
 0x26b   :  { %v191_v39 = vpop.eup %190 }
 0x26c   :  { %v193_v40 = vpop.eup %192  ;;  %v134_v41 = vmul.f32 %v191_v39, %v187_v28 }
 0x26d   :  { %v136_v43 = vmul.f32 %v193_v40, %v189_v29 }
 0x26e   :  { %v137_v42 = vsub.f32 0.0, %v134_v41 }
 0x26f   :  { %v138_v44 = vsub.f32 0.0, %v136_v43 }
 0x270   :  { %142 = vperm.xlu0 %185, %v137_v42  }
 0x274   :  { %145 = vperm.xlu0 %185, %v138_v44  }
 0x2eb   :  { %v143_v45 = vpop.permute.xlu0 %142 }
 0x2ec   :  { %v150_v47 = vrot.slane %v143_v45, %v71_v12 }
 0x2ef   :  { %v146_v46 = vpop.permute.xlu0 %145 }
 0x2f0   :  { %v154_v48 = vrot.slane %v146_v46, %v71_v12 }
 0x2f2   :  { %v155_v49 = vsel %vm77_vm1, %v154_v48, %v150_v47 }
 0x2f3   :  { %157 = vst.msk [vmem:[#allocation7] sm:$0x3] %vm80_vm2, %v155_v49 }
 0x2f4   :  { %245 = shalt.err (!%p242_p0)
}
 0x2f5   :  { %167 = dma.vmem_to_hbm [thread:$0]  %s165_s1, 32, %s300_s2, [#allocation4]  }
 0x2f6   :  { %258 = dma.done.wait [#allocation4], 32  }
 0x2f7   :  { %259 = vsyncadd [#allocation4], 4294967264 }
 0x2f8   :  { %171 = vsyncpa [#allocation3], 1 }
 0x2f9   :  { %172 = vsyncpa [#allocation6], 1 }
 0x2fa   :  { %173 = vsyncpa [#allocation4], 1 }

</bundles_post_ra>
